<compile_context>
chip_gen: v5e
topology: v5e:2x2
jax: 0.10.0
libtpu: 0.0.40
codegen_flags: <defaults>
</compile_context>

<pallas_src>
import jax
import jax.numpy as jnp
from jax.experimental import pallas as pl
from jax.experimental.pallas import tpu as pltpu


_SUBLANE = 8      # f32 sublane packing
_MIN_PALLAS_BATCH = 512   # below this, plain XLA wins (launch overhead)


def _round_up(v, m):
    return -(-v // m) * m


def _fused_heads_kernel(x_ref, w_ref, b_ref, o_ref):
    # x_ref: (tm, E)   w_ref: (E, tn)   b_ref: (1, tn)   o_ref: (tm, tn)
    acc = jnp.dot(x_ref[...], w_ref[...], preferred_element_type=jnp.float32)
    # bias add in f32 on the MXU accumulator, single cast to the output dtype
    o_ref[...] = (acc + b_ref[...]).astype(o_ref.dtype)


def fused_linear_heads(x, w_all_t, b_all, *, use_pallas=None):
    """out = x @ w_all_t + b_all  for all heads in one lane-dense matmul.

    x:        (B, E)
    w_all_t:  (E, D_sum)  -- heads concatenated along the last dim, transposed
    b_all:    (D_sum,)
    returns:  (B, D_sum) in x.dtype
    """
    B, E = x.shape
    E2, D = w_all_t.shape
    assert E == E2 and b_all.shape == (D,)

    if use_pallas is None:
        use_pallas = B >= _MIN_PALLAS_BATCH
    if not use_pallas:
        # Tiny problem: one fused XLA dot, no kernel launch / pad / slice.
        return (x @ w_all_t + b_all[None, :]).astype(x.dtype)

    b2d = b_all.reshape(1, D).astype(jnp.float32)

    # Batch tile: >= 4 grid steps when possible (megacore on v7x), multiple of
    # the f32 sublane count, capped at 1024 rows (near-roofline tile size).
    tm = min(1024, max(_SUBLANE, _round_up(pl.cdiv(B, 4), _SUBLANE)))
    # Head tile: true width when small (unpadded store), 512 lanes when large.
    tn = D if D <= 512 else 512

    grid = (pl.cdiv(B, tm), pl.cdiv(D, tn))

    # Explicit VMEM budget: double-buffered x / W / bias / out tiles + slack.
    itemsize = 4
    vmem_need = 2 * itemsize * (tm * E + E * tn + tn + tm * tn) + (2 << 20)
    vmem_limit = int(min(max(vmem_need, 8 << 20), 128 << 20))

    cost = pl.CostEstimate(
        flops=2 * B * E * D,
        transcendentals=0,
        bytes_accessed=(B * E + E * D + D + B * D) * itemsize,
    )

    return pl.pallas_call(
        _fused_heads_kernel,
        out_shape=jax.ShapeDtypeStruct((B, D), x.dtype),
        grid=grid,
        in_specs=[
            pl.BlockSpec((tm, E), lambda i, j: (i, 0)),
            pl.BlockSpec((E, tn), lambda i, j: (0, j)),
            pl.BlockSpec((1, tn), lambda i, j: (0, j)),
        ],
        out_specs=pl.BlockSpec((tm, tn), lambda i, j: (i, j)),
        compiler_params=pltpu.CompilerParams(
            dimension_semantics=("parallel", "parallel"),
            vmem_limit_bytes=vmem_limit,
        ),
        cost_estimate=cost,
    )(x, w_all_t, b2d)


def init_params(key, embedding_size, action_space):
    """Per-head params mimicking nn.Linear default init (uniform +/- 1/sqrt(E))."""
    params = []
    bound = 1.0 / (embedding_size ** 0.5)
    for d in action_space:
        kw, kb, key = jax.random.split(key, 3)
        w = jax.random.uniform(kw, (d, embedding_size), jnp.float32, -bound, bound)
        b = jax.random.uniform(kb, (d,), jnp.float32, -bound, bound)
        params.append((w, b))
    return params


def fuse_params(params):
    """One-time layout prep: concat per-head (d, E) weights into (E, D_sum)."""
    dims = tuple(int(w.shape[0]) for (w, _) in params)
    w_all_t = jnp.concatenate([w for (w, _) in params], axis=0).T   # (E, D_sum)
    b_all = jnp.concatenate([b for (_, b) in params], axis=0)       # (D_sum,)
    return {"w_all_t": w_all_t, "b_all": b_all, "dims": dims}


def differentiable_action_values(thought_vector, fused_params, *, use_pallas=None):
    """Forward pass: returns a list with one logits tensor per action dim."""
    fused = fused_linear_heads(
        thought_vector, fused_params["w_all_t"], fused_params["b_all"],
        use_pallas=use_pallas)
    action_values = []
    off = 0
    for d in fused_params["dims"]:
        action_values.append(fused[:, off:off + d])
        off += d
    return action_values


if __name__ == "__main__":
    embedding_size = 32
    action_space = (5, 7, 3)   # one Linear head per action dimension

    key = jax.random.PRNGKey(0)
    kx, kx2, kp = jax.random.split(key, 3)
    params = init_params(kp, embedding_size, action_space)
    fused_params = fuse_params(params)   # one-time param prep (hoisted)

    # --- small batch (the module's typical shape); force the Pallas path so
    # --- the kernel itself is exercised and verified.
    x_small = jax.random.normal(kx, (2, embedding_size), dtype=jnp.float32)
    outs = differentiable_action_values(x_small, fused_params, use_pallas=True)
    outs = [jax.block_until_ready(o) for o in outs]
    for (w, b), o in zip(params, outs):
        ref = x_small @ w.T + b
        assert o.shape == ref.shape
        assert jnp.allclose(o, ref, atol=1e-5, rtol=1e-5)

    # --- larger batch: exercises multi-step grid + ragged final batch block
    x_big = jax.random.normal(kx2, (600, embedding_size), dtype=jnp.float32)
    outs_big = differentiable_action_values(x_big, fused_params, use_pallas=True)
    outs_big = [jax.block_until_ready(o) for o in outs_big]
    for (w, b), o in zip(params, outs_big):
        ref = x_big @ w.T + b
        assert o.shape == ref.shape
        assert jnp.allclose(o, ref, atol=1e-5, rtol=1e-5)

    # --- default (auto) path at tiny batch falls back to plain XLA
    outs_xla = differentiable_action_values(x_small, fused_params)
    outs_xla = [jax.block_until_ready(o) for o in outs_xla]
    for o_pal, o_xla in zip(outs, outs_xla):
        assert jnp.allclose(o_pal, o_xla, atol=1e-5, rtol=1e-5)

    print("KERNEL_OK")
</pallas_src>

<mosaic_0001>
module attributes {stable_mosaic.version = 11 : i64} {
  func.func @_fused_heads_kernel(%arg0: i32, %arg1: i32, %arg2: memref<8x32xf32, #tpu.memory_space<vmem>>, %arg3: memref<32x15xf32, #tpu.memory_space<vmem>>, %arg4: memref<1x15xf32, #tpu.memory_space<vmem>>, %arg5: memref<8x15xf32, #tpu.memory_space<vmem>>) attributes {dimension_semantics = [#tpu.dimension_semantics<parallel>, #tpu.dimension_semantics<parallel>], iteration_bounds = array<i64: 1, 1>, scalar_prefetch = 0 : i64, scratch_operands = 0 : i64, tpu.core_type = #tpu.core_type<tc>, window_params = [{transform_indices = @transform_0, window_bounds = array<i64: 8, 32>}, {transform_indices = @transform_1, window_bounds = array<i64: 32, 15>}, {transform_indices = @transform_2, window_bounds = array<i64: 1, 15>}, {transform_indices = @transform_3, window_bounds = array<i64: 8, 15>}]} {
    %c0 = arith.constant 0 : index
    %c0_0 = arith.constant 0 : index
    %0 = vector.load %arg2[%c0, %c0_0] : memref<8x32xf32, #tpu.memory_space<vmem>>, vector<8x32xf32>
    %c0_1 = arith.constant 0 : index
    %c0_2 = arith.constant 0 : index
    %1 = vector.load %arg3[%c0_1, %c0_2] : memref<32x15xf32, #tpu.memory_space<vmem>>, vector<32x15xf32>
    %cst = arith.constant dense<0.000000e+00> : vector<8x15xf32>
    %2 = tpu.matmul %0, %1, %cst {dimension_numbers = #tpu.dot_dimension_numbers<[1], [0], [0], [1], [0, 0, 1, 1], [], []>} : vector<8x32xf32>, vector<32x15xf32>, vector<8x15xf32> -> vector<8x15xf32>
    %c0_3 = arith.constant 0 : index
    %c0_4 = arith.constant 0 : index
    %3 = vector.load %arg4[%c0_3, %c0_4] : memref<1x15xf32, #tpu.memory_space<vmem>>, vector<1x15xf32>
    %4 = vector.broadcast %3 : vector<1x15xf32> to vector<8x15xf32>
    %5 = arith.addf %2, %4 : vector<8x15xf32>
    %c0_5 = arith.constant 0 : index
    %c0_6 = arith.constant 0 : index
    %6 = vector.load %arg5[%c0_5, %c0_6] : memref<8x15xf32, #tpu.memory_space<vmem>>, vector<8x15xf32>
    tpu.vector_store %arg5[%c0_5, %c0_6], %5 {strides = array<i32>} : memref<8x15xf32, #tpu.memory_space<vmem>>, vector<8x15xf32>,
    return
  }
  func.func @transform_0(%arg0: i32, %arg1: i32) -> (i32, i32) {
    %c0_i32 = arith.constant 0 : i32
    %c0_i32_0 = arith.constant 0 : i32
    return %arg0, %c0_i32 : i32, i32
  }
  func.func @transform_1(%arg0: i32, %arg1: i32) -> (i32, i32) {
    %c0_i32 = arith.constant 0 : i32
    %c0_i32_0 = arith.constant 0 : i32
    return %c0_i32, %arg1 : i32, i32
  }
  func.func @transform_2(%arg0: i32, %arg1: i32) -> (i32, i32) {
    %c0_i32 = arith.constant 0 : i32
    %c0_i32_0 = arith.constant 0 : i32
    return %c0_i32, %arg1 : i32, i32
  }
  func.func @transform_3(%arg0: i32, %arg1: i32) -> (i32, i32) {
    %c0_i32 = arith.constant 0 : i32
    return %arg0, %arg1 : i32, i32
  }
}

</mosaic_0001>

<bundles_post_ra>
// kernel: tpu_custom_call.1
= control target key start
LH: loop header
LB: loop body
LE: loop exit
PB: predicated region body
PF: predicated region fallthrough
CT: control target
= control target key end

     0   :  { %8 = vsyncpa [#allocation3], 0  ;;  %vm24_vm0 = vcmask 261120   ;;  %vm48_vm1 = vcmask 121856   ;;  %s143_s0 = inlined_call_operand.vmem [shape: f32[2,32], index: 0, kind: input, shape index: {}]   ;;  %s144_s1 = inlined_call_operand.vmem [shape: f32[32,15], index: 1, kind: input, shape index: {}]   ;;  %s145_s2 = inlined_call_operand.vmem [shape: f32[1,15], index: 2, kind: input, shape index: {}]   ;;  %s146_s3 = inlined_call_operand.hbm [shape: f32[2,15], index: 3, kind: output, shape index: {}]  }
   0x1   :  { %v19_v0 = vld [vmem:[%s144_s1 + $0x18] sm:$0xff]  ;;  %v18_v1 = vld [vmem:[%s144_s1 + $0x10] sm:$0xff]  ;;  %v17_v2 = vld [vmem:[%s144_s1 + $0x8] sm:$0xff] }
   0x2   :  { %40 = vmatpush.msra.mxu0 %v19_v0  ;;  %v16_v3 = vld [vmem:[%s144_s1] sm:$0xff] }
   0x3   :  { %v15_v4 = vld [vmem:[%s143_s0] sm:$0xff] }
   0x4   :  { %41 = vmatpush.msra.mxu0 %v18_v1  ;;  %v72_v5 = vld [vmem:[%s145_s2] ss:$0 sm:$0xff] }
   0x6   :  { %42 = vmatpush.msra.mxu0 %v17_v2 }
   0x8   :  { %43 = vmatpush.msra.mxu0 %v16_v3 }
   0x9   :  { %68 = vmatmul.msk.f32.vlgmr.msra.gmra.mxu0 %vm24_vm0, %v15_v4 }
  0x86   :  { %v45_v6 = vpop.f32.mrf.mxu0 }
  0x87   :  { %v46_v7 = vadd.f32 %v72_v5, %v45_v6 }
  0x89   :  { %49 = vst.msk [vmem:[#allocation2] sm:$0xff] %vm48_vm1, %v46_v7 }
  0x8a   :  { %53 = vsyncadd [#allocation3], 96  ;;  %s56_s1 = sshll.u32 %s146_s3, 4  ;;  %s99_s26 = smov [#allocation2]   ;;  %s57_s1 = int_to_ptr.hbm [resolvable:$true] %s56_s1 }
  0x8b   :  { %s54_s27 = sshll.u32 %s99_s26, 4  ;;  %s100_s0 = smov 32   ;;  %s55_s27 = int_to_ptr.vmem [resolvable:$true] %s54_s27 }
  0x8c   :  { %s101_s28 = smov 2  }
  0x8d   :  { %62 = dma.vmem_to_hbm [thread:$0]  %s55_s27, 32, %s57_s1, [#allocation3], %s100_s0, %s100_s0, %s101_s28  }
  0x8e   :  { %97 = dma.done.wait [#allocation3], 128  }
  0x8f   :  { %98 = vsyncadd [#allocation3], 4294967168 }
  0x90   :  { %67 = vsyncpa [#allocation3], 1 }

</bundles_post_ra>
